<compile_context>
chip_gen: v7x
topology: tpu7x:2x2x1
jax: 0.10.0
libtpu: 0.0.40
codegen_flags: <defaults>
</compile_context>

<pallas_src>
import jax
import jax.numpy as jnp
from jax.experimental import pallas as pl
from jax.experimental.pallas import tpu as pltpu

# Padded (lane-aligned) layer widths.  Logical widths are 400 / 300 / 1.
H1 = 512     # 400 -> 512
H2 = 384     # 300 -> 384
HOUT = 128   # 1   -> 128 compute slab (Q lives in column 0; store is transposed)


def _round_up(x, m):
    return (x + m - 1) // m * m


def critic_kernel(xu_ref, w1_ref, b1_ref, w2_ref, b2_ref, w3_ref, b3_ref, out_ref):
    # ---- Layer 1: Linear(state_dim + action_dim -> 400[512]) + ReLU --------
    # xu is already bf16; single contiguous matmul replaces the split-W1 pair.
    h1 = jnp.dot(xu_ref[...], w1_ref[...], preferred_element_type=jnp.float32)
    h1 = jnp.maximum(h1 + b1_ref[...], 0.0)          # bias/ReLU in f32

    # ---- Layer 2: Linear(400[512] -> 300[384]) + ReLU -----------------------
    h2 = jnp.dot(h1.astype(jnp.bfloat16), w2_ref[...],
                 preferred_element_type=jnp.float32)
    h2 = jnp.maximum(h2 + b2_ref[...], 0.0)

    # ---- Layer 3: Linear(300[384] -> 1[128 slab]) ----------------------------
    q = jnp.dot(h2.astype(jnp.bfloat16), w3_ref[...],
                preferred_element_type=jnp.float32) + b3_ref[...]

    # Lane-dense writeback: transpose the slab (XLU slot, ~free) and store only
    # row 0 (= real Q column) as a (1, tile_b) block -> no 128x zero writeback.
    out_ref[...] = jnp.transpose(q)[0:1, :]


def _select_tile(B):
    """Pick (tile_b, B_pad): minimize padding waste, prefer >=2 grid steps
    (v7x megacore), then prefer the largest tile to amortize grid overhead."""
    B8 = _round_up(max(B, 1), 8)
    if B8 <= 128:
        # Single tiny tile; block shapes fall back to full-array extents.
        return B8, B8
    best = None
    for t in (128, 256, 512, 1024, 2048):        # all lane-aligned (out block)
        bp = _round_up(B8, t)
        waste = bp - B
        single = 0 if bp // t >= 2 else 1        # prefer grid extent >= 2 (v7x)
        key = (waste, single, -t)
        if best is None or key < best[0]:
            best = (key, t, bp)
    return best[1], best[2]


def critic_forward(x, u, kernel_params):
    """x: [B, state_dim], u: [B, action_dim] -> Q: [B, 1] (float32)."""
    w1, b1, w2, b2, w3, b3 = kernel_params
    B = x.shape[0]
    d_in = x.shape[1] + u.shape[1]

    tile_b, B_pad = _select_tile(B)

    # Wrapper-side concat is layout plumbing; ship inputs to the kernel as bf16
    # since they are only consumed as bf16 MXU operands (halves input HBM bytes).
    xu = jnp.concatenate([x, u], axis=1).astype(jnp.bfloat16)
    if B_pad != B:
        xu = jnp.pad(xu, ((0, B_pad - B), (0, 0)))

    grid = (B_pad // tile_b,)

    # Activations tiled along batch; weights & biases map to block (0, 0) every
    # step, so they stay VMEM-resident across the grid.
    in_specs = [
        pl.BlockSpec((tile_b, d_in), lambda i: (i, 0)),   # xu  (bf16)
        pl.BlockSpec((d_in, H1), lambda i: (0, 0)),       # W1  (bf16)
        pl.BlockSpec((1, H1), lambda i: (0, 0)),          # b1  (f32)
        pl.BlockSpec((H1, H2), lambda i: (0, 0)),         # W2  (bf16)
        pl.BlockSpec((1, H2), lambda i: (0, 0)),          # b2  (f32)
        pl.BlockSpec((H2, HOUT), lambda i: (0, 0)),       # W3  (bf16)
        pl.BlockSpec((1, HOUT), lambda i: (0, 0)),        # b3  (f32)
    ]
    # Transposed, lane-dense Q output: one row, batch along lanes.
    out_specs = pl.BlockSpec((1, tile_b), lambda i: (0, i))

    out = pl.pallas_call(
        critic_kernel,
        out_shape=jax.ShapeDtypeStruct((1, B_pad), jnp.float32),
        grid=grid,
        in_specs=in_specs,
        out_specs=out_specs,
        compiler_params=pltpu.CompilerParams(
            dimension_semantics=("parallel",),   # megacore-shardable on v7x
            vmem_limit_bytes=32 * 1024 * 1024,   # large tiles fit on v5e too
        ),
    )(xu, w1, b1, w2, b2, w3, b3)

    # TODO(synk): for TD3-style training, fuse the twin Q-heads (stack the two
    # layer-3 columns -> effective N=256 MXU pass) and/or the target network into
    # this pallas_call so the ~0.5 MiB of bf16 weights is streamed once per call.
    return jnp.transpose(out[:, :B])   # [1, B] -> [B, 1]


def init_critic_params(key, state_dim, action_dim):
    """PyTorch nn.Linear default init: U(-1/sqrt(fan_in), 1/sqrt(fan_in)).
    Returns logical (unpadded) f32 params, weights stored as [in, out]."""
    dims = [(state_dim + action_dim, 400), (400, 300), (300, 1)]
    params = []
    for fan_in, fan_out in dims:
        key, kw, kb = jax.random.split(key, 3)
        bound = 1.0 / (fan_in ** 0.5)
        w = jax.random.uniform(kw, (fan_in, fan_out), jnp.float32, -bound, bound)
        b = jax.random.uniform(kb, (1, fan_out), jnp.float32, -bound, bound)
        params.extend([w, b])
    return tuple(params)


def pad_and_cast_params(logical_params, state_dim, action_dim):
    """Zero-pad to lane-aligned widths, cast weights to bf16 (biases stay f32)."""
    w1, b1, w2, b2, w3, b3 = logical_params
    d_in = state_dim + action_dim
    w1p = jnp.zeros((d_in, H1), jnp.float32).at[:, :400].set(w1)
    b1p = jnp.zeros((1, H1), jnp.float32).at[:, :400].set(b1)
    w2p = jnp.zeros((H1, H2), jnp.float32).at[:400, :300].set(w2)
    b2p = jnp.zeros((1, H2), jnp.float32).at[:, :300].set(b2)
    w3p = jnp.zeros((H2, HOUT), jnp.float32).at[:300, :1].set(w3)
    b3p = jnp.zeros((1, HOUT), jnp.float32).at[:, :1].set(b3)
    return (w1p.astype(jnp.bfloat16), b1p,
            w2p.astype(jnp.bfloat16), b2p,
            w3p.astype(jnp.bfloat16), b3p)


def critic_reference(x, u, logical_params):
    """Pure-JAX reference matching the kernel's arithmetic (bf16 matmul inputs,
    f32 accumulation, f32 bias/ReLU)."""
    w1, b1, w2, b2, w3, b3 = logical_params

    def mm(a, w):
        return jnp.dot(a.astype(jnp.bfloat16), w.astype(jnp.bfloat16),
                       preferred_element_type=jnp.float32)

    h = jnp.concatenate([x, u], axis=1).astype(jnp.float32)
    h = jnp.maximum(mm(h, w1) + b1, 0.0)
    h = jnp.maximum(mm(h, w2) + b2, 0.0)
    return mm(h, w3) + b3


if __name__ == "__main__":
    state_dim, action_dim, batch = 16, 4, 8

    key = jax.random.PRNGKey(0)
    key, kx, ku = jax.random.split(key, 3)
    x = jax.random.normal(kx, (batch, state_dim), jnp.float32)
    u = jax.random.normal(ku, (batch, action_dim), jnp.float32)

    logical_params = init_critic_params(jax.random.PRNGKey(0), state_dim, action_dim)
    kernel_params = pad_and_cast_params(logical_params, state_dim, action_dim)

    q = critic_forward(x, u, kernel_params)
    q = jax.block_until_ready(q)

    q_ref = critic_reference(x, u, logical_params)
    assert q.shape == (batch, 1)
    assert jnp.allclose(q, q_ref, atol=2e-3, rtol=2e-3), (
        f"max abs err {jnp.max(jnp.abs(q - q_ref))}")
    print("KERNEL_OK")
</pallas_src>

<mosaic_0001>
module attributes {stable_mosaic.version = 11 : i64} {
  func.func @critic_kernel(%arg0: i32, %arg1: memref<8x20xbf16, #tpu.memory_space<vmem>>, %arg2: memref<20x512xbf16, #tpu.memory_space<vmem>>, %arg3: memref<1x512xf32, #tpu.memory_space<vmem>>, %arg4: memref<512x384xbf16, #tpu.memory_space<vmem>>, %arg5: memref<1x384xf32, #tpu.memory_space<vmem>>, %arg6: memref<384x128xbf16, #tpu.memory_space<vmem>>, %arg7: memref<1x128xf32, #tpu.memory_space<vmem>>, %arg8: memref<1x8xf32, #tpu.memory_space<vmem>>) attributes {dimension_semantics = [#tpu.dimension_semantics<parallel>], iteration_bounds = array<i64: 1>, scalar_prefetch = 0 : i64, scratch_operands = 0 : i64, tpu.core_type = #tpu.core_type<tc>, window_params = [{transform_indices = @transform_0, window_bounds = array<i64: 8, 20>}, {pipeline_mode = #tpu.pipeline_mode<synchronous>, transform_indices = @transform_1, window_bounds = array<i64: 20, 512>}, {pipeline_mode = #tpu.pipeline_mode<synchronous>, transform_indices = @transform_2, window_bounds = array<i64: 1, 512>}, {pipeline_mode = #tpu.pipeline_mode<synchronous>, transform_indices = @transform_3, window_bounds = array<i64: 512, 384>}, {pipeline_mode = #tpu.pipeline_mode<synchronous>, transform_indices = @transform_4, window_bounds = array<i64: 1, 384>}, {pipeline_mode = #tpu.pipeline_mode<synchronous>, transform_indices = @transform_5, window_bounds = array<i64: 384, 128>}, {pipeline_mode = #tpu.pipeline_mode<synchronous>, transform_indices = @transform_6, window_bounds = array<i64: 1, 128>}, {transform_indices = @transform_7, window_bounds = array<i64: 1, 8>}]} {
    %c0 = arith.constant 0 : index
    %c0_0 = arith.constant 0 : index
    %0 = vector.load %arg1[%c0, %c0_0] : memref<8x20xbf16, #tpu.memory_space<vmem>>, vector<8x20xbf16>
    %c0_1 = arith.constant 0 : index
    %c0_2 = arith.constant 0 : index
    %1 = vector.load %arg2[%c0_1, %c0_2] : memref<20x512xbf16, #tpu.memory_space<vmem>>, vector<20x512xbf16>
    %cst = arith.constant dense<0.000000e+00> : vector<8x512xf32>
    %2 = tpu.matmul %0, %1, %cst {dimension_numbers = #tpu.dot_dimension_numbers<[1], [0], [0], [1], [0, 0, 1, 1], [], []>} : vector<8x20xbf16>, vector<20x512xbf16>, vector<8x512xf32> -> vector<8x512xf32>
    %c0_3 = arith.constant 0 : index
    %c0_4 = arith.constant 0 : index
    %3 = vector.load %arg3[%c0_3, %c0_4] : memref<1x512xf32, #tpu.memory_space<vmem>>, vector<1x512xf32>
    %4 = vector.broadcast %3 : vector<1x512xf32> to vector<8x512xf32>
    %5 = arith.addf %2, %4 : vector<8x512xf32>
    %cst_5 = arith.constant 0.000000e+00 : f32
    %6 = vector.broadcast %cst_5 : f32 to vector<8x512xf32>
    %7 = arith.maximumf %5, %6 : vector<8x512xf32>
    %8 = arith.truncf %7 : vector<8x512xf32> to vector<8x512xbf16>
    %c0_6 = arith.constant 0 : index
    %c0_7 = arith.constant 0 : index
    %9 = vector.load %arg4[%c0_6, %c0_7] : memref<512x384xbf16, #tpu.memory_space<vmem>>, vector<512x384xbf16>
    %cst_8 = arith.constant dense<0.000000e+00> : vector<8x384xf32>
    %10 = tpu.matmul %8, %9, %cst_8 {dimension_numbers = #tpu.dot_dimension_numbers<[1], [0], [0], [1], [0, 0, 1, 1], [], []>} : vector<8x512xbf16>, vector<512x384xbf16>, vector<8x384xf32> -> vector<8x384xf32>
    %c0_9 = arith.constant 0 : index
    %c0_10 = arith.constant 0 : index
    %11 = vector.load %arg5[%c0_9, %c0_10] : memref<1x384xf32, #tpu.memory_space<vmem>>, vector<1x384xf32>
    %12 = vector.broadcast %11 : vector<1x384xf32> to vector<8x384xf32>
    %13 = arith.addf %10, %12 : vector<8x384xf32>
    %cst_11 = arith.constant 0.000000e+00 : f32
    %14 = vector.broadcast %cst_11 : f32 to vector<8x384xf32>
    %15 = arith.maximumf %13, %14 : vector<8x384xf32>
    %16 = arith.truncf %15 : vector<8x384xf32> to vector<8x384xbf16>
    %c0_12 = arith.constant 0 : index
    %c0_13 = arith.constant 0 : index
    %17 = vector.load %arg6[%c0_12, %c0_13] : memref<384x128xbf16, #tpu.memory_space<vmem>>, vector<384x128xbf16>
    %cst_14 = arith.constant dense<0.000000e+00> : vector<8x128xf32>
    %18 = tpu.matmul %16, %17, %cst_14 {dimension_numbers = #tpu.dot_dimension_numbers<[1], [0], [0], [1], [0, 0, 1, 1], [], []>} : vector<8x384xbf16>, vector<384x128xbf16>, vector<8x128xf32> -> vector<8x128xf32>
    %c0_15 = arith.constant 0 : index
    %c0_16 = arith.constant 0 : index
    %19 = vector.load %arg7[%c0_15, %c0_16] : memref<1x128xf32, #tpu.memory_space<vmem>>, vector<1x128xf32>
    %20 = vector.broadcast %19 : vector<1x128xf32> to vector<8x128xf32>
    %21 = arith.addf %18, %20 : vector<8x128xf32>
    %22 = tpu.transpose %21, [1, 0] : vector<8x128xf32> -> vector<128x8xf32>
    %23 = vector.extract_strided_slice %22 {offsets = [0, 0], sizes = [1, 8], strides = [1, 1]} : vector<128x8xf32> to vector<1x8xf32>
    %c0_17 = arith.constant 0 : index
    %c0_18 = arith.constant 0 : index
    %24 = vector.load %arg8[%c0_17, %c0_18] : memref<1x8xf32, #tpu.memory_space<vmem>>, vector<1x8xf32>
    tpu.vector_store %arg8[%c0_17, %c0_18], %23 {strides = array<i32>} : memref<1x8xf32, #tpu.memory_space<vmem>>, vector<1x8xf32>,
    return
  }
  func.func @transform_0(%arg0: i32) -> (i32, i32) {
    %c0_i32 = arith.constant 0 : i32
    %c0_i32_0 = arith.constant 0 : i32
    return %arg0, %c0_i32 : i32, i32
  }
  func.func @transform_1(%arg0: i32) -> (i32, i32) {
    %c0_i32 = arith.constant 0 : i32
    %c0_i32_0 = arith.constant 0 : i32
    %c0_i32_1 = arith.constant 0 : i32
    return %c0_i32, %c0_i32_0 : i32, i32
  }
  func.func @transform_2(%arg0: i32) -> (i32, i32) {
    %c0_i32 = arith.constant 0 : i32
    %c0_i32_0 = arith.constant 0 : i32
    %c0_i32_1 = arith.constant 0 : i32
    return %c0_i32, %c0_i32_0 : i32, i32
  }
  func.func @transform_3(%arg0: i32) -> (i32, i32) {
    %c0_i32 = arith.constant 0 : i32
    %c0_i32_0 = arith.constant 0 : i32
    %c0_i32_1 = arith.constant 0 : i32
    return %c0_i32, %c0_i32_0 : i32, i32
  }
  func.func @transform_4(%arg0: i32) -> (i32, i32) {
    %c0_i32 = arith.constant 0 : i32
    %c0_i32_0 = arith.constant 0 : i32
    %c0_i32_1 = arith.constant 0 : i32
    return %c0_i32, %c0_i32_0 : i32, i32
  }
  func.func @transform_5(%arg0: i32) -> (i32, i32) {
    %c0_i32 = arith.constant 0 : i32
    %c0_i32_0 = arith.constant 0 : i32
    %c0_i32_1 = arith.constant 0 : i32
    return %c0_i32, %c0_i32_0 : i32, i32
  }
  func.func @transform_6(%arg0: i32) -> (i32, i32) {
    %c0_i32 = arith.constant 0 : i32
    %c0_i32_0 = arith.constant 0 : i32
    %c0_i32_1 = arith.constant 0 : i32
    return %c0_i32, %c0_i32_0 : i32, i32
  }
  func.func @transform_7(%arg0: i32) -> (i32, i32) {
    %c0_i32 = arith.constant 0 : i32
    %c0_i32_0 = arith.constant 0 : i32
    return %c0_i32, %arg0 : i32, i32
  }
}

</mosaic_0001>

<bundles_post_ra>
// kernel: tpu_custom_call.1
= control target key start
LH: loop header
LB: loop body
LE: loop exit
PB: predicated region body
PF: predicated region fallthrough
CT: control target
= control target key end

     0   :  { %12 = vsyncpa [#allocation3], 0  ;;  %s2084_s0 = inlined_call_operand.hbm [shape: bf16[8,20], index: 0, kind: input, shape index: {}]   ;;  %s2085_s1 = inlined_call_operand.hbm [shape: bf16[20,512], index: 1, kind: input, shape index: {}]   ;;  %s2086_s2 = inlined_call_operand.vmem [shape: f32[1,512], index: 2, kind: input, shape index: {}]   ;;  %s2087_s3 = inlined_call_operand.hbm [shape: bf16[512,384], index: 3, kind: input, shape index: {}]   ;;  %s2088_s4 = inlined_call_operand.vmem [shape: f32[1,384], index: 4, kind: input, shape index: {}]   ;;  %s2089_s5 = inlined_call_operand.hbm [shape: bf16[384,128], index: 5, kind: input, shape index: {}]   ;;  %s2090_s6 = inlined_call_operand.vmem [shape: f32[1,128], index: 6, kind: input, shape index: {}]   ;;  %s2091_s7 = inlined_call_operand.hbm [shape: f32[1,8], index: 7, kind: output, shape index: {}]  }
   0x1   :  { %13 = vsyncpa [#allocation6], 0 }
   0x2   :  { %14 = vsyncpa [#allocation9], 0 }
   0x3   :  { %15 = vsyncpa [#allocation4], 0  ;;  %s1930_s24 = smov [#allocation5]   ;;  %s1812_s28 = scalar_lea.hbm %s2085_s1, 768 }
   0x4   :  { %s31_s25 = sshll.u32 %s1930_s24, 4  ;;  %p1813_p0 = scmp.ne.s32.totalorder %s2085_s1, %s1812_s28  ;;  %s32_s25 = int_to_ptr.vmem [resolvable:$true] %s31_s25 }
   0x5   :  { %p1816_p1 = scmp.lt.u32.totalorder %s1812_s28, %s2085_s1 }
   0x7   :  { %p1818_p2 = pnand %p1816_p1, %p1813_p0 }
   0x9   :  { %1821 = shalt.err (!%p1818_p2)
}
   0xa   :  { %s1822_s10 = scalar_lea.vmem %s32_s25, 768  ;;  %p1827_p4 = scmp.lt.s32.totalorder %s32_s25, %s32_s25 }
   0xb   :  { %p1823_p3 = scmp.ne.s32.totalorder %s32_s25, %s1822_s10  ;;  %p1828_p5 = scmp.lt.s32.totalorder %s1822_s10, %s1822_s10 }
   0xd   :  { %p1829_p6 = por %p1828_p5, %p1827_p4 }
   0xf   :  { %p1830_p7 = pnand %p1829_p6, %p1823_p3 }
  0x11   :  { %1833 = shalt.err (!%p1830_p7)
}
  0x12   :  { %s1931_s11 = smov 256   ;;  %s1932_s12 = smov 16  }
  0x13   :  { %37 = dma.hbm_to_vmem [thread:$0]  %s2085_s1, 768, %s32_s25, [#allocation6], %s1931_s11, %s1931_s11, %s1932_s12  }
  0x14   :  { %s1933_s15 = smov [#allocation2]   ;;  %s1934_s17 = smov [#allocation7]  }
  0x15   :  { %s22_s16 = sshll.u32 %s1933_s15, 4  ;;  %s45_s18 = sshll.u32 %s1934_s17, 4  ;;  %s23_s16 = int_to_ptr.vmem [resolvable:$true] %s22_s16  ;;  %s46_s18 = int_to_ptr.vmem [resolvable:$true] %s45_s18 }
  0x16   :  { %s1834_s21 = scalar_lea.hbm %s2084_s0, 64 }
  0x17   :  { %p1835_p8 = scmp.ne.s32.totalorder %s2084_s0, %s1834_s21  ;;  %p1838_p9 = scmp.lt.u32.totalorder %s1834_s21, %s2084_s0 }
  0x19   :  { %p1840_p10 = pnand %p1838_p9, %p1835_p8 }
  0x1b   :  { %1843 = shalt.err (!%p1840_p10)
}
  0x1c   :  { %s1844_s1 = scalar_lea.vmem %s23_s16, 64  ;;  %p1849_p12 = scmp.lt.s32.totalorder %s23_s16, %s23_s16 }
  0x1d   :  { %p1845_p11 = scmp.ne.s32.totalorder %s23_s16, %s1844_s1  ;;  %p1850_p13 = scmp.lt.s32.totalorder %s1844_s1, %s1844_s1 }
  0x1f   :  { %p1851_p0 = por %p1850_p13, %p1849_p12 }
  0x21   :  { %p1852_p1 = pnand %p1851_p0, %p1845_p11 }
  0x23   :  { %1855 = shalt.err (!%p1852_p1)
}
  0x24   :  { %25 = dma.hbm_to_vmem [thread:$0]  %s2084_s0, 64, %s23_s16, [#allocation3]  }
  0x25   :  { %s1856_s30 = scalar_lea.hbm %s2087_s3, 12288 }
  0x26   :  { %p1857_p2 = scmp.ne.s32.totalorder %s2087_s3, %s1856_s30  ;;  %p1860_p3 = scmp.lt.u32.totalorder %s1856_s30, %s2087_s3 }
  0x28   :  { %p1862_p4 = pnand %p1860_p3, %p1857_p2 }
  0x2a   :  { %1865 = shalt.err (!%p1862_p4)
}
  0x2b   :  { %s1866_s12 = scalar_lea.vmem %s46_s18, 12288  ;;  %p1871_p6 = scmp.lt.s32.totalorder %s46_s18, %s46_s18 }
  0x2c   :  { %p1867_p5 = scmp.ne.s32.totalorder %s46_s18, %s1866_s12  ;;  %p1872_p7 = scmp.lt.s32.totalorder %s1866_s12, %s1866_s12 }
  0x2e   :  { %p1873_p8 = por %p1872_p7, %p1871_p6 }
  0x30   :  { %p1874_p9 = pnand %p1873_p8, %p1867_p5 }
  0x32   :  { %1877 = shalt.err (!%p1874_p9)
}
  0x33   :  { %s1935_s0 = smov 192   ;;  %s1936_s13 = smov 12  }
  0x34   :  { %51 = dma.hbm_to_vmem [thread:$0]  %s2087_s3, 12288, %s46_s18, [#allocation6], %s1935_s0, %s1935_s0, %s1936_s13  }
  0x35   :  { %s1937_s16 = smov [#allocation8]   ;;  %s1878_s21 = scalar_lea.hbm %s2089_s5, 3072 }
  0x36   :  { %s59_s17 = sshll.u32 %s1937_s16, 4  ;;  %p1879_p10 = scmp.ne.s32.totalorder %s2089_s5, %s1878_s21  ;;  %s60_s17 = int_to_ptr.vmem [resolvable:$true] %s59_s17 }
  0x37   :  { %p1882_p11 = scmp.lt.u32.totalorder %s1878_s21, %s2089_s5 }
  0x39   :  { %p1884_p12 = pnand %p1882_p11, %p1879_p10 }
  0x3b   :  { %1887 = shalt.err (!%p1884_p12)
}
  0x3c   :  { %s1888_s1 = scalar_lea.vmem %s60_s17, 3072  ;;  %p1893_p0 = scmp.lt.s32.totalorder %s60_s17, %s60_s17 }
  0x3d   :  { %p1889_p13 = scmp.ne.s32.totalorder %s60_s17, %s1888_s1  ;;  %p1894_p1 = scmp.lt.s32.totalorder %s1888_s1, %s1888_s1 }
  0x3f   :  { %p1895_p2 = por %p1894_p1, %p1893_p0 }
  0x41   :  { %p1896_p3 = pnand %p1895_p2, %p1889_p13 }
  0x43   :  { %1899 = shalt.err (!%p1896_p3)
}
  0x44   :  { %s1938_s3 = smov 64   ;;  %s1939_s18 = smov 4  }
  0x45   :  { %65 = dma.hbm_to_vmem [thread:$0]  %s2089_s5, 3072, %s60_s17, [#allocation9], %s1938_s3, %s1938_s3, %s1939_s18  }
  0x46   :  { %1922 = dma.done.wait [#allocation3], 64  }
  0x47   :  { %1923 = vsyncadd [#allocation3], 4294967232 }
  0x48   :  { %1924 = dma.done.wait [#allocation6], 13056  }
  0x49   :  { %1925 = vsyncadd [#allocation6], 4294954240 }
  0x4a   :  { %1926 = dma.done.wait [#allocation9], 3072  }
  0x4b   :  { %1927 = vsyncadd [#allocation9], 4294964224  ;;  %v1940_v0 = vmov 0   ;;  %v1650_v1 = vld [vmem:[#allocation5 + $0x4] ss:$16 sps:$4 sm:$0xff]   ;;  %vm144_vm0 = vcmask 1041408  }
  0x4c   :  { %189 = vmatprep.mubr.bf16.mxu0 %v1940_v0  ;;  %230 = vmatprep.mubr.bf16.mxu1 %v1940_v0  ;;  %v1652_v2 = vld [vmem:[#allocation5] ss:$16 sps:$4 sm:$0xff]   ;;  %v1655_v6 = vld [vmem:[#allocation5 + $0xc] ss:$16 sps:$4 sm:$0xff]   ;;  %v1657_v7 = vld [vmem:[#allocation5 + $0x8] ss:$16 sps:$4 sm:$0xff]   ;;  %v90_v0 = vlaneseq }
  0x4d   :  { %v86_v3 = vld [vmem:[#allocation5 + $0x20] sm:$0x33]  ;;  %157 = vmatprep.subr.bf16.mxu0 %v1650_v1  ;;  %v87_v8 = vld [vmem:[#allocation5 + $0x28] sm:$0x33]  ;;  %198 = vmatprep.subr.bf16.mxu1 %v1655_v6  ;;  %v81_v14 = vld [vmem:[#allocation2] sm:$0xf] }
  0x4e   :  { %v1407_v4 = vcombine.high %v86_v3, %v86_v3  ;;  %v1406_v5 = vcombine.low %v86_v3, %v86_v3  ;;  %158 = vmatpush1.bf16.msra.mxu0 %v1652_v2  ;;  %v1409_v10 = vcombine.high %v87_v8, %v87_v8  ;;  %v1408_v11 = vcombine.low %v87_v8, %v87_v8  ;;  %v1662_v12 = vld [vmem:[#allocation7 + $0x4] ss:$12 sps:$4 sm:$0xff]   ;;  %v1660_v15 = vld [vmem:[#allocation7] ss:$12 sps:$4 sm:$0xff]   ;;  %v1665_v16 = vld [vmem:[#allocation7 + $0x1c] ss:$12 sps:$4 sm:$0xff]  }
  0x4f   :  { %199 = vmatpush1.bf16.msra.mxu1 %v1657_v7  ;;  %vm140_vm1 = vcmask 162816   ;;  %v1663_v17 = vld [vmem:[#allocation7 + $0x18] ss:$12 sps:$4 sm:$0xff]   ;;  %v1668_v18 = vld [vmem:[#allocation7 + $0x34] ss:$12 sps:$4 sm:$0xff]   ;;  %v2036_v1 = vshrl.u32 %v90_v0, 7 }
  0x50   :  { %1410 = vmatprep.subr.msk.bf16.mxu0 %vm144_vm0, %v1407_v4  ;;  %v146_v9 = vsel %vm144_vm0, %v1406_v5, 0  ;;  %1412 = vmatprep.subr.msk.bf16.mxu1 %vm144_vm0, %v1409_v10  ;;  %v152_v13 = vsel %vm144_vm0, %v1408_v11, 0  ;;  %v1666_v19 = vld [vmem:[#allocation7 + $0x30] ss:$12 sps:$4 sm:$0xff]   ;;  %v1671_v20 = vld [vmem:[#allocation7 + $0x4c] ss:$12 sps:$4 sm:$0xff]  }
  0x51   :  { %v1687_v21 = vld [vmem:[#allocation7 + $0xc8] ss:$12 sps:$4 sm:$0xff]   ;;  %v1674_v24 = vld [vmem:[#allocation7 + $0x64] ss:$12 sps:$4 sm:$0xff]   ;;  %v1692_v25 = vld [vmem:[#allocation7 + $0xe0] ss:$12 sps:$4 sm:$0xff]  }
  0x52   :  { %160 = vmatpush1.bf16.msra.mxu0 %v146_v9  ;;  %v1688_v22 = vld [vmem:[#allocation7 + $0x8] ss:$12 sps:$4 sm:$0xff]   ;;  %v1693_v26 = vld [vmem:[#allocation7 + $0x20] ss:$12 sps:$4 sm:$0xff]   ;;  %v1697_v29 = vld [vmem:[#allocation7 + $0xf8] ss:$12 sps:$4 sm:$0xff]  }
  0x53   :  { %904 = vmatprep.subr.bf16.mxu0 %v1662_v12  ;;  %201 = vmatpush1.bf16.msra.mxu1 %v152_v13  ;;  %v1669_v23 = vld [vmem:[#allocation7 + $0x48] ss:$12 sps:$4 sm:$0xff]   ;;  %v1672_v27 = vld [vmem:[#allocation7 + $0x60] ss:$12 sps:$4 sm:$0xff]   ;;  %v1698_v30 = vld [vmem:[#allocation7 + $0x38] ss:$12 sps:$4 sm:$0xff]  }
  0x54   :  { %1535 = vmatprep.subr.bf16.mxu1 %v1687_v21  ;;  %v1677_v28 = vld [vmem:[#allocation7 + $0x7c] ss:$12 sps:$4 sm:$0xff]   ;;  %v1675_v31 = vld [vmem:[#allocation7 + $0x78] ss:$12 sps:$4 sm:$0xff]   ;;  %v1680_v34 = vld [vmem:[#allocation7 + $0x94] ss:$12 sps:$4 sm:$0xff]  }
  0x55   :  { %1411 = vmatmul.mubr.msk.bf16.vlgmr.msra.gmra.mrb[0].mxu0 %vm140_vm1, %v81_v14  ;;  %v1702_v32 = vld [vmem:[#allocation7 + $0x110] ss:$12 sps:$4 sm:$0xff]   ;;  %v1707_v35 = vld [vmem:[#allocation7 + $0x128] ss:$12 sps:$4 sm:$0xff]   ;;  %v1683_v38 = vld [vmem:[#allocation7 + $0xac] ss:$12 sps:$4 sm:$0xff]  }
  0x56   :  { %905 = vmatpush1.bf16.msra.mxu0 %v1660_v15  ;;  %1413 = vmatmul.mubr.msk.bf16.vlgmr.msra.gmra.mrb[0].mxu1 %vm140_vm1, %v81_v14  ;;  %v1703_v33 = vld [vmem:[#allocation7 + $0x50] ss:$12 sps:$4 sm:$0xff]   ;;  %v1708_v37 = vld [vmem:[#allocation7 + $0x68] ss:$12 sps:$4 sm:$0xff]   ;;  %v1712_v40 = vld [vmem:[#allocation7 + $0x140] ss:$12 sps:$4 sm:$0xff]  }
  0x57   :  { %906 = vmatprep.subr.bf16.mxu0 %v1665_v16  ;;  %1536 = vmatpush3.bf16.msra.mxu1 %v1688_v22  ;;  %v1678_v36 = vld [vmem:[#allocation7 + $0x90] ss:$12 sps:$4 sm:$0xff]   ;;  %v1681_v39 = vld [vmem:[#allocation7 + $0xa8] ss:$12 sps:$4 sm:$0xff]   ;;  %v1713_v42 = vld [vmem:[#allocation7 + $0x80] ss:$12 sps:$4 sm:$0xff]  }
  0x58   :  { %1537 = vmatprep.subr.bf16.mxu1 %v1692_v25  ;;  %v1686_v41 = vld [vmem:[#allocation7 + $0xc4] ss:$12 sps:$4 sm:$0xff]   ;;  %v1684_v43 = vld [vmem:[#allocation7 + $0xc0] ss:$12 sps:$4 sm:$0xff]   ;;  %v1691_v44 = vld [vmem:[#allocation7 + $0xdc] ss:$12 sps:$4 sm:$0xff]  }
  0x59   :  { %v1689_v45 = vld [vmem:[#allocation7 + $0xd8] ss:$12 sps:$4 sm:$0xff]   ;;  %v1696_v46 = vld [vmem:[#allocation7 + $0xf4] ss:$12 sps:$4 sm:$0xff]   ;;  %v1694_v47 = vld [vmem:[#allocation7 + $0xf0] ss:$12 sps:$4 sm:$0xff]  }
  0x5a   :  { %907 = vmatpush1.bf16.msra.mxu0 %v1663_v17  ;;  %v1701_v48 = vld [vmem:[#allocation7 + $0x10c] ss:$12 sps:$4 sm:$0xff]   ;;  %v1699_v49 = vld [vmem:[#allocation7 + $0x108] ss:$12 sps:$4 sm:$0xff]   ;;  %v1706_v50 = vld [vmem:[#allocation7 + $0x124] ss:$12 sps:$4 sm:$0xff]  }
  0x5b   :  { %908 = vmatprep.subr.bf16.mxu0 %v1668_v18  ;;  %1538 = vmatpush3.bf16.msra.mxu1 %v1693_v26  ;;  %v1704_v51 = vld [vmem:[#allocation7 + $0x120] ss:$12 sps:$4 sm:$0xff]   ;;  %v1711_v52 = vld [vmem:[#allocation7 + $0x13c] ss:$12 sps:$4 sm:$0xff]   ;;  %v1709_v53 = vld [vmem:[#allocation7 + $0x138] ss:$12 sps:$4 sm:$0xff]  }
  0x5c   :  { %1539 = vmatprep.subr.bf16.mxu1 %v1697_v29  ;;  %v1716_v54 = vld [vmem:[#allocation7 + $0x154] ss:$12 sps:$4 sm:$0xff]   ;;  %v1717_v55 = vld [vmem:[#allocation7 + $0x158] ss:$12 sps:$4 sm:$0xff]   ;;  %v1714_v56 = vld [vmem:[#allocation7 + $0x150] ss:$12 sps:$4 sm:$0xff]  }
  0x5d   :  { %v1718_v57 = vld [vmem:[#allocation7 + $0x98] ss:$12 sps:$4 sm:$0xff]   ;;  %v1722_v59 = vld [vmem:[#allocation7 + $0x170] ss:$12 sps:$4 sm:$0xff]   ;;  %v1719_v60 = vld [vmem:[#allocation7 + $0x168] ss:$12 sps:$4 sm:$0xff]  }
  0x5e   :  { %909 = vmatpush1.bf16.msra.mxu0 %v1666_v19  ;;  %v1721_v58 = vld [vmem:[#allocation7 + $0x16c] ss:$12 sps:$4 sm:$0xff]   ;;  %v1723_v61 = vld [vmem:[#allocation7 + $0xb0] ss:$12 sps:$4 sm:$0xff]   ;;  %v1727_v63 = vld [vmem:[#allocation7 + $0x248] ss:$12 sps:$4 sm:$0xff]  }
  0x5f   :  { %910 = vmatprep.subr.bf16.mxu0 %v1671_v20  ;;  %1540 = vmatpush3.bf16.msra.mxu1 %v1698_v30  ;;  %v1726_v62 = vld [vmem:[#allocation7 + $0x184] ss:$12 sps:$4 sm:$0xff]   ;;  %v92_v2 = vsub.s32 0, %v2036_v1  ;;  %v2042_v3 = vld [vmem:[%s2086_s2] sm:$0xf]  ;;  %v96_v4 = vsub.s32 1, %v2036_v1 }
  0x60   :  { %1541 = vmatprep.subr.bf16.mxu1 %v1702_v32  ;;  %v104_v5 = vsub.s32 3, %v2036_v1  ;;  %v1729_v30 = vld [vmem:[#allocation7 + $0x198] ss:$12 sps:$4 sm:$0xff]   ;;  %v1736_v32 = vld [vmem:[#allocation7 + $0x1b4] ss:$12 sps:$4 sm:$0xff]   ;;  %vm1942_vm2 = vmmov 0  }
  0x61   :  { %v93_v6 = vrot.slane %v2042_v3, %v92_v2  ;;  %v97_v7 = vrot.slane %v2042_v3, %v96_v4  ;;  %v1767_v0 = vld [vmem:[#allocation7 + $0x258] ss:$12 sps:$4 sm:$0xff]   ;;  %s1943_s8 = smov [#allocation10]   ;;  %vm1383_vm3 = vcmask 57344  }
  0x62   :  { %911 = vmatpush1.bf16.msra.mxu0 %v1669_v23  ;;  %v105_v9 = vrot.slane %v2042_v3, %v104_v5  ;;  %v1724_v23 = vld [vmem:[#allocation7 + $0x180] ss:$12 sps:$4 sm:$0xff]   ;;  %v1770_v5 = vld [vmem:[#allocation7 + $0x270] ss:$12 sps:$4 sm:$0xff]   ;;  %s1391_s9 = sshll.u32 %s1943_s8, 4  ;;  %s1392_s9 = int_to_ptr.vmem [resolvable:$true] %s1391_s9 }
  0x63   :  { %912 = vmatprep.subr.bf16.mxu0 %v1674_v24  ;;  %1542 = vmatpush3.bf16.msra.mxu1 %v1703_v33  ;;  %v1728_v24 = vld [vmem:[#allocation7 + $0x188] ss:$12 sps:$4 sm:$0xff]   ;;  %v1737_v33 = vld [vmem:[#allocation7 + $0x278] ss:$12 sps:$4 sm:$0xff]   ;;  %s1900_s10 = scalar_lea.vmem %s1392_s9, 16  ;;  %s1904_s11 = scalar_lea.vmem %s1392_s9, 32 }
  0x64   :  { %1543 = vmatprep.subr.bf16.mxu1 %v1707_v35  ;;  %v1738_v35 = vld [vmem:[#allocation7 + $0x1b8] ss:$12 sps:$4 sm:$0xff]   ;;  %p1901_p4 = scmp.ne.s32.totalorder %s1392_s9, %s1900_s10  ;;  %p1905_p5 = scmp.lt.s32.totalorder %s1392_s9, %s1392_s9 }
  0x65   :  { %p1906_p6 = scmp.lt.s32.totalorder %s1904_s11, %s1900_s10 }
  0x66   :  { %913 = vmatpush1.bf16.msra.mxu0 %v1672_v27  ;;  %v1731_v27 = vld [vmem:[#allocation7 + $0x19c] ss:$12 sps:$4 sm:$0xff]  }
  0x67   :  { %914 = vmatprep.subr.bf16.mxu0 %v1677_v28  ;;  %1544 = vmatpush3.bf16.msra.mxu1 %v1708_v37  ;;  %v1732_v28 = vld [vmem:[#allocation7 + $0x260] ss:$12 sps:$4 sm:$0xff]   ;;  %v1742_v37 = vld [vmem:[#allocation7 + $0x290] ss:$12 sps:$4 sm:$0xff]   ;;  %p1907_p7 = por %p1906_p6, %p1905_p5 }
  0x68   :  { %1545 = vmatprep.subr.bf16.mxu1 %v1712_v40  ;;  %v1746_v40 = vld [vmem:[#allocation7 + $0x1e4] ss:$12 sps:$4 sm:$0xff]  }
  0x69   :  { %p1908_p8 = pnand %p1907_p7, %p1901_p4 }
  0x6a   :  { %915 = vmatpush1.bf16.msra.mxu0 %v1675_v31  ;;  %v1733_v31 = vld [vmem:[#allocation7 + $0x1a0] ss:$12 sps:$4 sm:$0xff]  }
  0x6b   :  { %916 = vmatprep.subr.bf16.mxu0 %v1680_v34  ;;  %1546 = vmatpush3.bf16.msra.mxu1 %v1713_v42  ;;  %v1734_v34 = vld [vmem:[#allocation7 + $0x1b0] ss:$12 sps:$4 sm:$0xff]   ;;  %v100_v42 = vsub.s32 2, %v2036_v1 }
  0x6c   :  { %1547 = vmatprep.subr.bf16.mxu1 %v1717_v55  ;;  %v1761_v55 = vld [vmem:[#allocation7 + $0x22c] ss:$12 sps:$4 sm:$0xff]   ;;  %v1806_v1 = vld [vmem:[#allocation8 + $0x90] sm:$0xff]  }
  0x6e   :  { %917 = vmatpush1.bf16.msra.mxu0 %v1678_v36  ;;  %v1741_v36 = vld [vmem:[#allocation7 + $0x1cc] ss:$12 sps:$4 sm:$0xff]  }
  0x6f   :  { %918 = vmatprep.subr.bf16.mxu0 %v1683_v38  ;;  %1548 = vmatpush3.bf16.msra.mxu1 %v1718_v57  ;;  %v1739_v38 = vld [vmem:[#allocation7 + $0x1c8] ss:$12 sps:$4 sm:$0xff]  }
  0x70   :  { %1549 = vmatprep.subr.bf16.mxu1 %v1722_v59  ;;  %v1763_v59 = vld [vmem:[#allocation7 + $0x230] ss:$12 sps:$4 sm:$0xff]  }
  0x72   :  { %919 = vmatpush1.bf16.msra.mxu0 %v1681_v39  ;;  %v1743_v39 = vld [vmem:[#allocation7 + $0x1d0] ss:$12 sps:$4 sm:$0xff]  }
  0x73   :  { %920 = vmatprep.subr.bf16.mxu0 %v1686_v41  ;;  %1550 = vmatpush3.bf16.msra.mxu1 %v1723_v61  ;;  %v1747_v41 = vld [vmem:[#allocation7 + $0x2a8] ss:$12 sps:$4 sm:$0xff]  }
  0x74   :  { %1557 = vmatprep.subr.bf16.mxu1 %v1727_v63  ;;  %v1769_v63 = vld [vmem:[#allocation7 + $0x25c] ss:$12 sps:$4 sm:$0xff]  }
  0x76   :  { %921 = vmatpush1.bf16.msra.mxu0 %v1684_v43  ;;  %v1744_v43 = vld [vmem:[#allocation7 + $0x1e0] ss:$12 sps:$4 sm:$0xff]  }
  0x77   :  { %922 = vmatprep.subr.bf16.mxu0 %v1691_v44  ;;  %v1748_v44 = vld [vmem:[#allocation7 + $0x1e8] ss:$12 sps:$4 sm:$0xff]  }
  0x7a   :  { %923 = vmatpush1.bf16.msra.mxu0 %v1689_v45  ;;  %v1751_v45 = vld [vmem:[#allocation7 + $0x1fc] ss:$12 sps:$4 sm:$0xff]  }
  0x7b   :  { %924 = vmatprep.subr.bf16.mxu0 %v1696_v46  ;;  %v1752_v46 = vld [vmem:[#allocation7 + $0x2c0] ss:$12 sps:$4 sm:$0xff]  }
  0x7e   :  { %925 = vmatpush1.bf16.msra.mxu0 %v1694_v47  ;;  %v101_v47 = vrot.slane %v2042_v3, %v100_v42  ;;  %v1772_v3 = vld [vmem:[#allocation7 + $0x274] ss:$12 sps:$4 sm:$0xff]  }
  0x7f   :  { %926 = vmatprep.subr.bf16.mxu0 %v1701_v48  ;;  %v1749_v48 = vld [vmem:[#allocation7 + $0x1f8] ss:$12 sps:$4 sm:$0xff]  }
  0x82   :  { %927 = vmatpush1.bf16.msra.mxu0 %v1699_v49  ;;  %v1753_v49 = vld [vmem:[#allocation7 + $0x200] ss:$12 sps:$4 sm:$0xff]  }
  0x83   :  { %928 = vmatprep.subr.bf16.mxu0 %v1706_v50  ;;  %v1756_v50 = vld [vmem:[#allocation7 + $0x214] ss:$12 sps:$4 sm:$0xff]  }
  0x86   :  { %929 = vmatpush1.bf16.msra.mxu0 %v1704_v51  ;;  %v1757_v51 = vld [vmem:[#allocation7 + $0x2d8] ss:$12 sps:$4 sm:$0xff]  }
  0x87   :  { %930 = vmatprep.subr.bf16.mxu0 %v1711_v52 }
  0x8a   :  { %931 = vmatpush1.bf16.msra.mxu0 %v1709_v53  ;;  %v1754_v53 = vld [vmem:[#allocation7 + $0x210] ss:$12 sps:$4 sm:$0xff]  }
  0x8b   :  { %932 = vmatprep.subr.bf16.mxu0 %v1716_v54  ;;  %v1758_v54 = vld [vmem:[#allocation7 + $0x218] ss:$12 sps:$4 sm:$0xff]  }
  0x8e   :  { %933 = vmatpush1.bf16.msra.mxu0 %v1714_v56  ;;  %v1762_v56 = vld [vmem:[#allocation7 + $0x2f0] ss:$12 sps:$4 sm:$0xff]  }
  0x8f   :  { %934 = vmatprep.subr.bf16.mxu0 %v1721_v58  ;;  %v1759_v58 = vld [vmem:[#allocation7 + $0x228] ss:$12 sps:$4 sm:$0xff]  }
  0x92   :  { %935 = vmatpush1.bf16.msra.mxu0 %v1719_v60  ;;  %v1766_v60 = vld [vmem:[#allocation7 + $0x244] ss:$12 sps:$4 sm:$0xff]  }
  0x93   :  { %945 = vmatprep.subr.bf16.mxu0 %v1726_v62  ;;  %v1764_v62 = vld [vmem:[#allocation7 + $0x240] ss:$12 sps:$4 sm:$0xff]  }
 0x128   :  { %v191_v8 = vpop.f32.mrb[0].mxu0 }
 0x129   :  { %v192_v10 = vadd.f32 %v191_v8, %v93_v6  ;;  %v193_v11 = vpop.f32.mrb[1].mxu0  ;;  %v2053_v14 = vpop.f32.mrb[0].mxu1  ;;  %v1775_v6 = vld [vmem:[#allocation7 + $0x28c] ss:$12 sps:$4 sm:$0xff]   ;;  %v1778_v8 = vld [vmem:[#allocation7 + $0x2a4] ss:$12 sps:$4 sm:$0xff]  }
 0x12a   :  { %v194_v12 = vadd.f32 %v193_v11, %v97_v7  ;;  %v195_v13 = vpop.f32.mrb[2].mxu0  ;;  %v234_v17 = vpop.f32.mrb[1].mxu1  ;;  %v233_v52 = vadd.f32 %v2053_v14, %v101_v47  ;;  %v1773_v7 = vld [vmem:[#allocation7 + $0x288] ss:$12 sps:$4 sm:$0xff]   ;;  %v1779_v11 = vld [vmem:[#allocation7 + $0x2b8] ss:$12 sps:$4 sm:$0xff]  }
 0x12b   :  { %v239_v15 = vmax.f32 %v192_v10, 0.0  ;;  %v196_v16 = vpop.f32.mrb[3].mxu0  ;;  %v235_v19 = vadd.f32 %v234_v17, %v105_v9  ;;  %v236_v20 = vpop.f32.mrb[2].mxu1  ;;  %v1776_v9 = vld [vmem:[#allocation7 + $0x2a0] ss:$12 sps:$4 sm:$0xff]  }
 0x12c   :  { %v240_v18 = vmax.f32 %v194_v12, 0.0  ;;  %v237_v21 = vpop.f32.mrb[3].mxu1  ;;  %v241_v57 = vmax.f32 %v233_v52, 0.0  ;;  %v1781_v10 = vld [vmem:[#allocation7 + $0x2bc] ss:$12 sps:$4 sm:$0xff]   ;;  %v1788_v16 = vld [vmem:[#allocation8 + $0x40] sm:$0xff]  }
 0x12d   :  { %v242_v25 = vmax.f32 %v235_v19, 0.0  ;;  %v243_v26 = vpack.c.bf16 %v239_v15, %v239_v15  ;;  %v1784_v12 = vld [vmem:[#allocation7 + $0x2d4] ss:$12 sps:$4 sm:$0xff]   ;;  %v1782_v13 = vld [vmem:[#allocation7 + $0x2d0] ss:$12 sps:$4 sm:$0xff]   ;;  %v1791_v19 = vld [vmem:[#allocation8 + $0x8] sm:$0xff]  }
 0x12e   :  { %v244_v22 = vpack.c.bf16 %v240_v18, %v240_v18  ;;  %v245_v61 = vpack.c.bf16 %v241_v57, %v241_v57  ;;  %v1787_v14 = vld [vmem:[#allocation7 + $0x2ec] ss:$12 sps:$4 sm:$0xff]   ;;  %v1785_v15 = vld [vmem:[#allocation7 + $0x2e8] ss:$12 sps:$4 sm:$0xff]   ;;  %v1789_v17 = vld [vmem:[#allocation8] sm:$0xff]  }
 0x12f   :  { %v246_v29 = vpack.c.bf16 %v242_v25, %v242_v25  ;;  %v1790_v18 = vld [vmem:[#allocation8 + $0x48] sm:$0xff]   ;;  %v1792_v20 = vld [vmem:[#allocation8 + $0x50] sm:$0xff]   ;;  %v1797_v25 = vld [vmem:[#allocation8 + $0x20] sm:$0xff]  }
 0x130   :  { %936 = vmatprep.mubr.bf16.mxu0 %v244_v22  ;;  %1018 = vmatprep.mubr.bf16.mxu1 %v244_v22  ;;  %v1793_v21 = vld [vmem:[#allocation8 + $0x10] sm:$0xff]   ;;  %v1794_v22 = vld [vmem:[#allocation8 + $0x58] sm:$0xff]  }
 0x131   :  { %937 = vmatmul.mubr.bf16.vlgmr.msra.gmra.mrb[4].mxu0 %v243_v26  ;;  %1019 = vmatmul.mubr.bf16.vlgmr.msra.gmra.mrb[4].mxu1 %v243_v26  ;;  %v1798_v26 = vld [vmem:[#allocation8 + $0x68] sm:$0xff]  }
 0x132   :  { %946 = vmatpush1.bf16.msra.mxu0 %v1724_v23  ;;  %1558 = vmatpush3.bf16.msra.mxu1 %v1728_v24  ;;  %v1795_v23 = vld [vmem:[#allocation8 + $0x18] sm:$0xff]   ;;  %v1796_v24 = vld [vmem:[#allocation8 + $0x60] sm:$0xff]  }
 0x133   :  { %947 = vmatprep.subr.bf16.mxu0 %v1731_v27  ;;  %1559 = vmatprep.subr.bf16.mxu1 %v1732_v28  ;;  %v1799_v27 = vld [vmem:[#allocation8 + $0x28] sm:$0xff]   ;;  %v1800_v28 = vld [vmem:[#allocation8 + $0x70] sm:$0xff]  }
 0x134   :  { %1058 = vmatprep.mubr.bf16.mxu1 %v246_v29  ;;  %977 = vmatprep.mubr.bf16.mxu0 %v246_v29  ;;  %v1801_v29 = vld [vmem:[#allocation8 + $0x30] sm:$0xff]  }
 0x136   :  { %948 = vmatpush1.bf16.msra.mxu0 %v1729_v30  ;;  %1560 = vmatpush3.bf16.msra.mxu1 %v1733_v31  ;;  %v1802_v30 = vld [vmem:[#allocation8 + $0x78] sm:$0xff]  }
 0x137   :  { %949 = vmatprep.subr.bf16.mxu0 %v1736_v32  ;;  %1561 = vmatprep.subr.bf16.mxu1 %v1737_v33  ;;  %v1803_v31 = vld [vmem:[#allocation8 + $0x38] sm:$0xff]   ;;  %v1941_v32 = vmov 0.0  }
 0x13a   :  { %950 = vmatpush1.bf16.msra.mxu0 %v1734_v34  ;;  %1562 = vmatpush3.bf16.msra.mxu1 %v1738_v35 }
 0x13b   :  { %951 = vmatprep.subr.bf16.mxu0 %v1741_v36  ;;  %1563 = vmatprep.subr.bf16.mxu1 %v1742_v37 }
 0x13e   :  { %952 = vmatpush1.bf16.msra.mxu0 %v1739_v38  ;;  %1564 = vmatpush3.bf16.msra.mxu1 %v1743_v39  ;;  %v375_v38 = vld [vmem:[%s2088_s4] sm:$0x7] }
 0x13f   :  { %953 = vmatprep.subr.bf16.mxu0 %v1746_v40  ;;  %1565 = vmatprep.subr.bf16.mxu1 %v1747_v41  ;;  %v388_v39 = vrot.slane %v375_v38, %v100_v42 }
 0x142   :  { %954 = vmatpush1.bf16.msra.mxu0 %v1744_v43  ;;  %1566 = vmatpush3.bf16.msra.mxu1 %v1748_v44 }
 0x143   :  { %955 = vmatprep.subr.bf16.mxu0 %v1751_v45  ;;  %1567 = vmatprep.subr.bf16.mxu1 %v1752_v46 }
 0x146   :  { %956 = vmatpush1.bf16.msra.mxu0 %v1749_v48  ;;  %1568 = vmatpush3.bf16.msra.mxu1 %v1753_v49  ;;  %v380_v48 = vrot.slane %v375_v38, %v92_v2  ;;  %v384_v49 = vrot.slane %v375_v38, %v96_v4  ;;  %v1807_v2 = vld [vmem:[#allocation8 + $0x98] sm:$0xff]   ;;  %v1808_v4 = vld [vmem:[#allocation8 + $0xa0] sm:$0xff]  }
 0x147   :  { %957 = vmatprep.subr.bf16.mxu0 %v1756_v50  ;;  %1569 = vmatprep.subr.bf16.mxu1 %v1757_v51 }
 0x14a   :  { %958 = vmatpush1.bf16.msra.mxu0 %v1754_v53  ;;  %1570 = vmatpush3.bf16.msra.mxu1 %v1758_v54 }
 0x14b   :  { %959 = vmatprep.subr.bf16.mxu0 %v1761_v55  ;;  %1571 = vmatprep.subr.bf16.mxu1 %v1762_v56 }
 0x14e   :  { %960 = vmatpush1.bf16.msra.mxu0 %v1759_v58  ;;  %1572 = vmatpush3.bf16.msra.mxu1 %v1763_v59  ;;  %v1804_v58 = vld [vmem:[#allocation8 + $0x80] sm:$0xff]  }
 0x14f   :  { %961 = vmatprep.subr.bf16.mxu0 %v1766_v60  ;;  %1579 = vmatprep.subr.bf16.mxu1 %v1788_v16  ;;  %v1805_v60 = vld [vmem:[#allocation8 + $0x88] sm:$0xff]  }
 0x151   :  { %1059 = vmatmul.mubr.bf16.vlgmr.msra.gmra.mrb[8].mxu1 %v245_v61 }
 0x152   :  { %962 = vmatpush1.bf16.msra.mxu0 %v1764_v62  ;;  %1580 = vmatpush3.bf16.msra.mxu1 %v1789_v17  ;;  %v1810_v62 = vld [vmem:[#allocation8 + $0xb0] sm:$0xff]  }
 0x153   :  { %963 = vmatprep.subr.bf16.mxu0 %v1769_v63  ;;  %1581 = vmatprep.subr.bf16.mxu1 %v1790_v18  ;;  %v1811_v63 = vld [vmem:[#allocation8 + $0xb8] sm:$0xff]  }
 0x156   :  { %964 = vmatpush1.bf16.msra.mxu0 %v1767_v0  ;;  %1582 = vmatpush3.bf16.msra.mxu1 %v1791_v19 }
 0x157   :  { %965 = vmatprep.subr.bf16.mxu0 %v1772_v3  ;;  %1583 = vmatprep.subr.bf16.mxu1 %v1792_v20 }
 0x15a   :  { %966 = vmatpush1.bf16.msra.mxu0 %v1770_v5  ;;  %1584 = vmatpush3.bf16.msra.mxu1 %v1793_v21 }
 0x15b   :  { %967 = vmatprep.subr.bf16.mxu0 %v1775_v6  ;;  %1585 = vmatprep.subr.bf16.mxu1 %v1794_v22 }
 0x15e   :  { %968 = vmatpush1.bf16.msra.mxu0 %v1773_v7  ;;  %1586 = vmatpush3.bf16.msra.mxu1 %v1795_v23 }
 0x15f   :  { %969 = vmatprep.subr.bf16.mxu0 %v1778_v8  ;;  %1587 = vmatprep.subr.bf16.mxu1 %v1796_v24 }
 0x162   :  { %970 = vmatpush1.bf16.msra.mxu0 %v1776_v9  ;;  %1588 = vmatpush3.bf16.msra.mxu1 %v1797_v25 }
 0x163   :  { %971 = vmatprep.subr.bf16.mxu0 %v1781_v10  ;;  %1589 = vmatprep.subr.bf16.mxu1 %v1798_v26  ;;  %v1510_v10 = vld [vmem:[%s2090_s6] ss:$0 sm:$0xff] }
 0x166   :  { %972 = vmatpush1.bf16.msra.mxu0 %v1779_v11  ;;  %1590 = vmatpush3.bf16.msra.mxu1 %v1799_v27 }
 0x167   :  { %973 = vmatprep.subr.bf16.mxu0 %v1784_v12  ;;  %1591 = vmatprep.subr.bf16.mxu1 %v1800_v28 }
 0x16a   :  { %974 = vmatpush1.bf16.msra.mxu0 %v1782_v13  ;;  %1592 = vmatpush3.bf16.msra.mxu1 %v1801_v29 }
 0x16b   :  { %975 = vmatprep.subr.bf16.mxu0 %v1787_v14  ;;  %1593 = vmatprep.subr.bf16.mxu1 %v1802_v30 }
 0x16e   :  { %976 = vmatpush1.bf16.msra.mxu0 %v1785_v15  ;;  %1594 = vmatpush3.bf16.msra.mxu1 %v1803_v31 }
 0x16f   :  { %1610 = vmatprep.subr.bf16.mxu1 %v1941_v32 }
 0x171   :  { %978 = vmatmul.mubr.bf16.vlgmr.msra.gmra.mrb[4].mxu0 %v245_v61  ;;  %v1809_v61 = vld [vmem:[#allocation8 + $0xa8] sm:$0xff]  }
 0x204   :  { %v1551_v33 = vpop.f32.mrb[4].mxu1 }
 0x205   :  { %v1552_v34 = vpop.f32.mrb[5].mxu1 }
 0x206   :  { %v1553_v35 = vadd.f32 %v1552_v34, %v1551_v33  ;;  %v1554_v36 = vpop.f32.mrb[6].mxu1 }
 0x207   :  { %v1555_v37 = vpop.f32.mrb[7].mxu1 }
 0x208   :  { %v1021_v43 = vadd.f32 %v1553_v35, %v388_v39 }
 0x224   :  { %v1573_v40 = vpop.f32.mrb[8].mxu1 }
 0x225   :  { %v1574_v41 = vpop.f32.mrb[9].mxu1 }
 0x226   :  { %v1575_v44 = vadd.f32 %v1574_v41, %v1573_v40  ;;  %v1576_v45 = vpop.f32.mrb[10].mxu1 }
 0x227   :  { %v1577_v46 = vpop.f32.mrb[11].mxu1 }
 0x228   :  { %v1061_v47 = vadd.f32 %v1575_v44, %v1021_v43 }
 0x22a   :  { %v1068_v0 = vmax.f32 %v1061_v47, 0.0 }
 0x22c   :  { %v1071_v3 = vpack.c.bf16 %v1068_v0, %v1068_v0 }
 0x244   :  { %v979_v50 = vpop.f32.mrb[4].mxu0 }
 0x245   :  { %v1630_v51 = vadd.f32 %v979_v50, %v380_v48  ;;  %v981_v52 = vpop.f32.mrb[5].mxu0 }
 0x246   :  { %v1631_v53 = vadd.f32 %v981_v52, %v384_v49  ;;  %v983_v54 = vpop.f32.mrb[6].mxu0 }
 0x247   :  { %v1066_v55 = vmax.f32 %v1630_v51, 0.0  ;;  %v984_v42 = vpop.f32.mrb[7].mxu0 }
 0x248   :  { %v1067_v56 = vmax.f32 %v1631_v53, 0.0 }
 0x249   :  { %v1069_v59 = vpack.c.bf16 %v1066_v55, %v1066_v55 }
 0x24a   :  { %v1070_v57 = vpack.c.bf16 %v1067_v56, %v1067_v56 }
 0x24c   :  { %1303 = vmatprep.mubr.bf16.mxu1 %v1070_v57 }
 0x24d   :  { %1304 = vmatmul.mubr.bf16.vlgmr.msra.gmra.mrb[12].mxu1 %v1069_v59 }
 0x24e   :  { %1611 = vmatpush3.bf16.msra.mxu1 %v1804_v58  ;;  %1626 = vmatprep.mubr.msk.bf16.mxu1 %vm1942_vm2, %v1941_v32 }
 0x24f   :  { %1612 = vmatprep.subr.bf16.mxu1 %v1941_v32 }
 0x252   :  { %1613 = vmatpush3.bf16.msra.mxu1 %v1805_v60 }
 0x253   :  { %1614 = vmatprep.subr.bf16.mxu1 %v1941_v32 }
 0x256   :  { %1615 = vmatpush3.bf16.msra.mxu1 %v1806_v1 }
 0x257   :  { %1616 = vmatprep.subr.bf16.mxu1 %v1941_v32 }
 0x25a   :  { %1617 = vmatpush3.bf16.msra.mxu1 %v1807_v2 }
 0x25b   :  { %1618 = vmatprep.subr.bf16.mxu1 %v1941_v32 }
 0x25e   :  { %1619 = vmatpush3.bf16.msra.mxu1 %v1808_v4 }
 0x25f   :  { %1620 = vmatprep.subr.bf16.mxu1 %v1941_v32 }
 0x262   :  { %1621 = vmatpush3.bf16.msra.mxu1 %v1809_v61 }
 0x263   :  { %1622 = vmatprep.subr.bf16.mxu1 %v1941_v32 }
 0x266   :  { %1623 = vmatpush3.bf16.msra.mxu1 %v1810_v62 }
 0x267   :  { %1624 = vmatprep.subr.bf16.mxu1 %v1941_v32 }
 0x26a   :  { %1625 = vmatpush3.bf16.msra.mxu1 %v1811_v63 }
 0x26d   :  { %1627 = vmatmul.mubr.bf16.vlgmr.msra.gmra.mrb[16].mxu1 %v1071_v3 }
 0x320   :  { %v1595_v5 = vpop.f32.mrb[12].mxu1 }
 0x321   :  { %v1596_v6 = vpop.f32.mrb[13].mxu1 }
 0x322   :  { %v1597_v7 = vadd.f32 %v1596_v6, %v1595_v5  ;;  %v1598_v8 = vpop.f32.mrb[14].mxu1 }
 0x323   :  { %v1599_v9 = vpop.f32.mrb[15].mxu1 }
 0x324   :  { %v1306_v11 = vadd.f32 %v1597_v7, %v1510_v10 }
 0x340   :  { %v1345_v12 = vpop.f32.mrb[16].mxu1 }
 0x341   :  { %v1628_v13 = vpop.f32.mrb[17].mxu1  ;;  %v1346_v14 = vadd.f32 %v1345_v12, %v1306_v11 }
 0x342   :  { %v1348_v15 = vpop.f32.mrb[18].mxu1 }
 0x343   :  { %v1629_v16 = vpop.f32.mrb[19].mxu1  ;;  %1351 = vxpose.xlu0.b32.start.end [1/1] (short) (narrow) %v1346_v14, 8 }
 0x3c3   :  { %v1367_v17 = vpop.trf.xlu0 }
 0x3c4   :  { %1384 = vst.msk [vmem:[#allocation10] sm:$0x1] %vm1383_vm3, %v1367_v17 }
 0x3c5   :  { %1911 = shalt.err (!%p1908_p8)
}
 0x3c6   :  { %s1912_s0 = scalar_lea.hbm %s2091_s7, 16 }
 0x3c7   :  { %p1913_p9 = scmp.ne.s32.totalorder %s2091_s7, %s1912_s0  ;;  %p1916_p10 = scmp.lt.u32.totalorder %s1912_s0, %s2091_s7 }
 0x3c9   :  { %p1918_p11 = pnand %p1916_p10, %p1913_p9 }
 0x3cb   :  { %1921 = shalt.err (!%p1918_p11)
}
 0x3cc   :  { %1394 = dma.vmem_to_hbm [thread:$0]  %s1392_s9, 16, %s2091_s7, [#allocation4]  }
 0x3cd   :  { %1928 = dma.done.wait [#allocation4], 16  }
 0x3ce   :  { %1929 = vsyncadd [#allocation4], 4294967280 }
 0x3cf   :  { %1398 = vsyncpa [#allocation3], 1 }
 0x3d0   :  { %1399 = vsyncpa [#allocation6], 1 }
 0x3d1   :  { %1400 = vsyncpa [#allocation9], 1 }
 0x3d2   :  { %1401 = vsyncpa [#allocation4], 1 }

</bundles_post_ra>
